<compile_context>
chip_gen: v7x
topology: tpu7x:2x2x1
jax: 0.10.0
libtpu: 0.0.40
codegen_flags: <defaults>
</compile_context>

<pallas_src>
import functools

import jax
import jax.numpy as jnp
from jax.experimental import pallas as pl
from jax.experimental.pallas import tpu as pltpu


def _skip_kernel(xcol_ref, xc_ref, wblk_ref, wdn_ref, bias_ref, out_ref):
    # xcol_ref: (R, W*9*Cin)  im2col slab, one row per image row       (32, 576)
    # xc_ref  : (R, W*Cin)    center-tap slab (the raw pixels)         (32,  64)
    # wblk_ref: (W*9*Cin, W*Cout)  block-diag 3x3 conv weight          (576,128)
    # wdn_ref : (W*Cin,   W*Cout)  block-diag 1x1 downsample weight    ( 64,128)
    # bias_ref: (2, W*Cout)   row 0 = block bias, row 1 = downsample bias
    # out_ref : (R, W*Cout)   lane-dense output rows                   (32, 128)
    z_blk = jnp.dot(xcol_ref[...], wblk_ref[...],
                    preferred_element_type=jnp.float32)            # 3x3 conv
    z_dn = jnp.dot(xc_ref[...], wdn_ref[...],
                   preferred_element_type=jnp.float32)             # 1x1 downsample
    blk = jnp.maximum(z_blk + bias_ref[0:1, :], 0.0)               # + bias, ReLU
    res = z_dn + bias_ref[1:2, :]                                  # + bias
    out_ref[...] = (blk + res).astype(out_ref.dtype)               # skip add


def pack_skip_params(wb, bb, wd, bd, W):
    """Pack conv parameters once (amortized across forward calls).

    wb: (Cout, Cin, 3, 3)   bb: (Cout,)
    wd: (Cout, Cin, 1, 1)   bd: (Cout,)
    Returns (w_block, w_down, bias2) with shapes
    (W*9*Cin, W*Cout), (W*Cin, W*Cout), (2, W*Cout).
    """
    Cout, Cin = wb.shape[0], wb.shape[1]
    K = 9 * Cin
    eye_w = jnp.eye(W, dtype=jnp.float32)

    # 3x3 weight: row index = tap*Cin + cin (tap = dy*3 + dx), matching im2col.
    wb_taps = jnp.transpose(wb, (2, 3, 1, 0)).reshape(K, Cout).astype(jnp.float32)
    w_block = jnp.kron(eye_w, wb_taps)                        # (W*K, W*Cout)

    # 1x1 weight applied to the raw (center-tap) pixels only.
    wd_mat = wd.reshape(Cout, Cin).T.astype(jnp.float32)      # (Cin, Cout)
    w_down = jnp.kron(eye_w, wd_mat)                          # (W*Cin, W*Cout)

    bias2 = jnp.stack([jnp.tile(bb, W), jnp.tile(bd, W)]).astype(jnp.float32)
    return w_block, w_down, bias2


@functools.partial(jax.jit, static_argnums=())
def skip_connection_forward(x_nchw, w_block, w_down, bias2):
    """x_nchw: (N, Cin, H, W) float32; packed params from pack_skip_params."""
    N, Cin, H, W = x_nchw.shape
    Lo = bias2.shape[1]                   # W * Cout
    Kb = w_block.shape[0]                 # W * 9 * Cin
    Kd = w_down.shape[0]                  # W * Cin
    R = N * H

    # --- glue (fused under this jit): NCHW -> NHWC, pad, im2col slab ---
    x_nhwc = jnp.transpose(x_nchw, (0, 2, 3, 1))                       # (N,H,W,Cin)
    xpad = jnp.pad(x_nhwc, ((0, 0), (1, 1), (1, 1), (0, 0)))           # (N,H+2,W+2,Cin)
    taps = [xpad[:, dy:dy + H, dx:dx + W, :]
            for dy in range(3) for dx in range(3)]                     # 9 x (N,H,W,Cin)
    xcol = jnp.stack(taps, axis=3).reshape(R, Kb)                      # (R, W*9*Cin)
    xc = x_nhwc.reshape(R, Kd)                                         # (R, W*Cin)

    out2d = pl.pallas_call(
        _skip_kernel,
        out_shape=jax.ShapeDtypeStruct((R, Lo), jnp.float32),
        grid=(1,),                                                     # single step
        in_specs=[
            pl.BlockSpec((R, Kb), lambda i: (0, 0)),      # im2col slab
            pl.BlockSpec((R, Kd), lambda i: (0, 0)),      # center-tap slab
            pl.BlockSpec((Kb, Lo), lambda i: (0, 0)),     # 3x3 block-diag weight
            pl.BlockSpec((Kd, Lo), lambda i: (0, 0)),     # 1x1 block-diag weight
            pl.BlockSpec((2, Lo), lambda i: (0, 0)),      # merged biases
        ],
        out_specs=pl.BlockSpec((R, Lo), lambda i: (0, 0)),
        compiler_params=pltpu.CompilerParams(
            dimension_semantics=("arbitrary",)),
    )(xcol, xc, w_block, w_down, bias2)

    out_nhwc = out2d.reshape(N, H, W, Lo // W)
    return jnp.transpose(out_nhwc, (0, 3, 1, 2))                       # back to NCHW


def _reference(x, wb, bb, wd, bd):
    conv = jax.lax.conv_general_dilated(
        x, wb, window_strides=(1, 1), padding="SAME",
        dimension_numbers=("NCHW", "OIHW", "NCHW"))
    blk = jax.nn.relu(conv + bb[None, :, None, None])
    res = jax.lax.conv_general_dilated(
        x, wd, window_strides=(1, 1), padding="SAME",
        dimension_numbers=("NCHW", "OIHW", "NCHW")) + bd[None, :, None, None]
    return blk + res


if __name__ == "__main__":
    N, Cin, Cout, H, W = 2, 4, 8, 16, 16

    key = jax.random.PRNGKey(0)
    k_x, k_wb, k_bb, k_wd, k_bd = jax.random.split(key, 5)
    x = jax.random.normal(k_x, (N, Cin, H, W), dtype=jnp.float32)
    wb = jax.random.normal(k_wb, (Cout, Cin, 3, 3), dtype=jnp.float32) * 0.1
    bb = jax.random.normal(k_bb, (Cout,), dtype=jnp.float32) * 0.1
    wd = jax.random.normal(k_wd, (Cout, Cin, 1, 1), dtype=jnp.float32) * 0.1
    bd = jax.random.normal(k_bd, (Cout,), dtype=jnp.float32) * 0.1

    # Parameter packing done ONCE (module-init time), amortized across calls.
    packed = jax.block_until_ready(pack_skip_params(wb, bb, wd, bd, W))

    out = jax.block_until_ready(skip_connection_forward(x, *packed))

    ref = jax.block_until_ready(_reference(x, wb, bb, wd, bd))
    assert out.shape == (N, Cout, H, W), out.shape
    assert jnp.allclose(out, ref, atol=1e-4, rtol=1e-4), float(jnp.abs(out - ref).max())

    print("KERNEL_OK")
</pallas_src>

<mosaic_0001>
module attributes {stable_mosaic.version = 11 : i64} {
  func.func @_skip_kernel(%arg0: i32, %arg1: memref<32x576xf32, #tpu.memory_space<vmem>>, %arg2: memref<32x64xf32, #tpu.memory_space<vmem>>, %arg3: memref<576x128xf32, #tpu.memory_space<vmem>>, %arg4: memref<64x128xf32, #tpu.memory_space<vmem>>, %arg5: memref<2x128xf32, #tpu.memory_space<vmem>>, %arg6: memref<32x128xf32, #tpu.memory_space<vmem>>) attributes {dimension_semantics = [#tpu.dimension_semantics<arbitrary>], iteration_bounds = array<i64: 1>, scalar_prefetch = 0 : i64, scratch_operands = 0 : i64, tpu.core_type = #tpu.core_type<tc>, window_params = [{pipeline_mode = #tpu.pipeline_mode<synchronous>, transform_indices = @transform_0, window_bounds = array<i64: 32, 576>}, {pipeline_mode = #tpu.pipeline_mode<synchronous>, transform_indices = @transform_1, window_bounds = array<i64: 32, 64>}, {pipeline_mode = #tpu.pipeline_mode<synchronous>, transform_indices = @transform_2, window_bounds = array<i64: 576, 128>}, {pipeline_mode = #tpu.pipeline_mode<synchronous>, transform_indices = @transform_3, window_bounds = array<i64: 64, 128>}, {pipeline_mode = #tpu.pipeline_mode<synchronous>, transform_indices = @transform_4, window_bounds = array<i64: 2, 128>}, {pipeline_mode = #tpu.pipeline_mode<synchronous>, transform_indices = @transform_5, window_bounds = array<i64: 32, 128>}]} {
    %c0 = arith.constant 0 : index
    %c0_0 = arith.constant 0 : index
    %0 = vector.load %arg1[%c0, %c0_0] : memref<32x576xf32, #tpu.memory_space<vmem>>, vector<32x576xf32>
    %c0_1 = arith.constant 0 : index
    %c0_2 = arith.constant 0 : index
    %1 = vector.load %arg3[%c0_1, %c0_2] : memref<576x128xf32, #tpu.memory_space<vmem>>, vector<576x128xf32>
    %cst = arith.constant dense<0.000000e+00> : vector<32x128xf32>
    %2 = tpu.matmul %0, %1, %cst {dimension_numbers = #tpu.dot_dimension_numbers<[1], [0], [0], [1], [0, 0, 1, 1], [], []>} : vector<32x576xf32>, vector<576x128xf32>, vector<32x128xf32> -> vector<32x128xf32>
    %c0_3 = arith.constant 0 : index
    %c0_4 = arith.constant 0 : index
    %3 = vector.load %arg2[%c0_3, %c0_4] : memref<32x64xf32, #tpu.memory_space<vmem>>, vector<32x64xf32>
    %c0_5 = arith.constant 0 : index
    %c0_6 = arith.constant 0 : index
    %4 = vector.load %arg4[%c0_5, %c0_6] : memref<64x128xf32, #tpu.memory_space<vmem>>, vector<64x128xf32>
    %cst_7 = arith.constant dense<0.000000e+00> : vector<32x128xf32>
    %5 = tpu.matmul %3, %4, %cst_7 {dimension_numbers = #tpu.dot_dimension_numbers<[1], [0], [0], [1], [0, 0, 1, 1], [], []>} : vector<32x64xf32>, vector<64x128xf32>, vector<32x128xf32> -> vector<32x128xf32>
    %c0_8 = arith.constant 0 : index
    %c0_9 = arith.constant 0 : index
    %6 = vector.load %arg5[%c0_8, %c0_9] : memref<2x128xf32, #tpu.memory_space<vmem>>, vector<1x128xf32>
    %7 = vector.broadcast %6 : vector<1x128xf32> to vector<32x128xf32>
    %8 = arith.addf %2, %7 : vector<32x128xf32>
    %cst_10 = arith.constant 0.000000e+00 : f32
    %9 = vector.broadcast %cst_10 : f32 to vector<32x128xf32>
    %10 = arith.maximumf %8, %9 : vector<32x128xf32>
    %c1 = arith.constant 1 : index
    %c0_11 = arith.constant 0 : index
    %11 = vector.load %arg5[%c1, %c0_11] : memref<2x128xf32, #tpu.memory_space<vmem>>, vector<1x128xf32>
    %12 = vector.broadcast %11 : vector<1x128xf32> to vector<32x128xf32>
    %13 = arith.addf %5, %12 : vector<32x128xf32>
    %14 = arith.addf %10, %13 : vector<32x128xf32>
    %c0_12 = arith.constant 0 : index
    %c0_13 = arith.constant 0 : index
    %15 = vector.load %arg6[%c0_12, %c0_13] : memref<32x128xf32, #tpu.memory_space<vmem>>, vector<32x128xf32>
    tpu.vector_store %arg6[%c0_12, %c0_13], %14 {strides = array<i32>} : memref<32x128xf32, #tpu.memory_space<vmem>>, vector<32x128xf32>,
    return
  }
  func.func @transform_0(%arg0: i32) -> (i32, i32) {
    %c0_i32 = arith.constant 0 : i32
    %c0_i32_0 = arith.constant 0 : i32
    %c0_i32_1 = arith.constant 0 : i32
    return %c0_i32, %c0_i32_0 : i32, i32
  }
  func.func @transform_1(%arg0: i32) -> (i32, i32) {
    %c0_i32 = arith.constant 0 : i32
    %c0_i32_0 = arith.constant 0 : i32
    %c0_i32_1 = arith.constant 0 : i32
    return %c0_i32, %c0_i32_0 : i32, i32
  }
  func.func @transform_2(%arg0: i32) -> (i32, i32) {
    %c0_i32 = arith.constant 0 : i32
    %c0_i32_0 = arith.constant 0 : i32
    %c0_i32_1 = arith.constant 0 : i32
    return %c0_i32, %c0_i32_0 : i32, i32
  }
  func.func @transform_3(%arg0: i32) -> (i32, i32) {
    %c0_i32 = arith.constant 0 : i32
    %c0_i32_0 = arith.constant 0 : i32
    %c0_i32_1 = arith.constant 0 : i32
    return %c0_i32, %c0_i32_0 : i32, i32
  }
  func.func @transform_4(%arg0: i32) -> (i32, i32) {
    %c0_i32 = arith.constant 0 : i32
    %c0_i32_0 = arith.constant 0 : i32
    %c0_i32_1 = arith.constant 0 : i32
    return %c0_i32, %c0_i32_0 : i32, i32
  }
  func.func @transform_5(%arg0: i32) -> (i32, i32) {
    %c0_i32 = arith.constant 0 : i32
    %c0_i32_0 = arith.constant 0 : i32
    %c0_i32_1 = arith.constant 0 : i32
    return %c0_i32, %c0_i32_0 : i32, i32
  }
}

</mosaic_0001>

<bundles_post_ra>
// kernel: skip_connection_forward.1
= control target key start
LH: loop header
LB: loop body
LE: loop exit
PB: predicated region body
PF: predicated region fallthrough
CT: control target
= control target key end

     0   :  { %vm129_vm0 = vcmask 523264   ;;  %s1145_s2 = inlined_call_operand.vmem [shape: f32[576,128], index: 2, kind: input, shape index: {}]   ;;  %s1146_s0 = inlined_call_operand.vmem [shape: f32[32,576], index: 0, kind: input, shape index: {}]   ;;  %s1147_s3 = inlined_call_operand.vmem [shape: f32[64,128], index: 3, kind: input, shape index: {}]   ;;  %s1148_s1 = inlined_call_operand.vmem [shape: f32[32,64], index: 1, kind: input, shape index: {}]   ;;  %s1149_s4 = inlined_call_operand.vmem [shape: f32[2,128], index: 4, kind: input, shape index: {}]   ;;  %s1150_s5 = inlined_call_operand.vmem [shape: f32[32,128], index: 5, kind: output, shape index: {}]  }
   0x1   :  { %v56_v0 = vld [vmem:[%s1145_s2 + $0x80] sm:$0xff]  ;;  %v57_v1 = vld [vmem:[%s1145_s2 + $0x88] sm:$0xff]  ;;  %v58_v11 = vld [vmem:[%s1145_s2 + $0x90] sm:$0xff] }
   0x2   :  { %v40_v2 = vld [vmem:[%s1145_s2] sm:$0xff]  ;;  %v681_v3 = vpack.c.bf16 %v57_v1, %v56_v0  ;;  %v41_v4 = vld [vmem:[%s1145_s2 + $0x8] sm:$0xff]  ;;  %v59_v13 = vld [vmem:[%s1145_s2 + $0x98] sm:$0xff] }
   0x3   :  { %v88_v5 = vld [vmem:[%s1145_s2 + $0x180] sm:$0xff]  ;;  %v89_v6 = vld [vmem:[%s1145_s2 + $0x188] sm:$0xff]  ;;  %v683_v7 = vpack.c.bf16 %v41_v4, %v40_v2  ;;  %v42_v14 = vld [vmem:[%s1145_s2 + $0x10] sm:$0xff]  ;;  %v685_v16 = vpack.c.bf16 %v59_v13, %v58_v11 }
   0x4   :  { %v713_v8 = vpack.c.bf16 %v89_v6, %v88_v5  ;;  %v72_v9 = vld [vmem:[%s1145_s2 + $0x100] sm:$0xff]  ;;  %v73_v10 = vld [vmem:[%s1145_s2 + $0x108] sm:$0xff]  ;;  %682 = vmatprep.subr.bf16.mxu0 %v681_v3  ;;  %v43_v15 = vld [vmem:[%s1145_s2 + $0x18] sm:$0xff] }
   0x5   :  { %v715_v12 = vpack.c.bf16 %v73_v10, %v72_v9  ;;  %684 = vmatpush3.bf16.msra.mxu0 %v683_v7  ;;  %v687_v17 = vpack.c.bf16 %v43_v15, %v42_v14  ;;  %v90_v18 = vld [vmem:[%s1145_s2 + $0x190] sm:$0xff]  ;;  %v91_v19 = vld [vmem:[%s1145_s2 + $0x198] sm:$0xff]  ;;  %v60_v23 = vld [vmem:[%s1145_s2 + $0xa0] sm:$0xff] }
   0x6   :  { %714 = vmatprep.subr.bf16.mxu1 %v713_v8  ;;  %v74_v20 = vld [vmem:[%s1145_s2 + $0x110] sm:$0xff]  ;;  %v717_v21 = vpack.c.bf16 %v91_v19, %v90_v18  ;;  %v75_v22 = vld [vmem:[%s1145_s2 + $0x118] sm:$0xff]  ;;  %v61_v24 = vld [vmem:[%s1145_s2 + $0xa8] sm:$0xff]  ;;  %686 = vmatprep.subr.bf16.mxu0 %v685_v16 }
   0x7   :  { %716 = vmatpush3.bf16.msra.mxu1 %v715_v12  ;;  %v719_v25 = vpack.c.bf16 %v75_v22, %v74_v20  ;;  %v689_v26 = vpack.c.bf16 %v61_v24, %v60_v23  ;;  %v44_v27 = vld [vmem:[%s1145_s2 + $0x20] sm:$0xff]  ;;  %v45_v28 = vld [vmem:[%s1145_s2 + $0x28] sm:$0xff]  ;;  %v62_v35 = vld [vmem:[%s1145_s2 + $0xb0] sm:$0xff] }
   0x8   :  { %v92_v29 = vld [vmem:[%s1145_s2 + $0x1a0] sm:$0xff]  ;;  %718 = vmatprep.subr.bf16.mxu1 %v717_v21  ;;  %v93_v30 = vld [vmem:[%s1145_s2 + $0x1a8] sm:$0xff]  ;;  %v691_v33 = vpack.c.bf16 %v45_v28, %v44_v27  ;;  %v63_v36 = vld [vmem:[%s1145_s2 + $0xb8] sm:$0xff] }
   0x9   :  { %v76_v31 = vld [vmem:[%s1145_s2 + $0x120] sm:$0xff]  ;;  %v77_v32 = vld [vmem:[%s1145_s2 + $0x128] sm:$0xff]  ;;  %688 = vmatpush3.bf16.msra.mxu0 %v687_v17  ;;  %v721_v34 = vpack.c.bf16 %v93_v30, %v92_v29  ;;  %v46_v37 = vld [vmem:[%s1145_s2 + $0x30] sm:$0xff]  ;;  %v693_v39 = vpack.c.bf16 %v63_v36, %v62_v35 }
   0xa   :  { %690 = vmatprep.subr.bf16.mxu0 %v689_v26  ;;  %v723_v38 = vpack.c.bf16 %v77_v32, %v76_v31  ;;  %v47_v40 = vld [vmem:[%s1145_s2 + $0x38] sm:$0xff]  ;;  %v94_v41 = vld [vmem:[%s1145_s2 + $0x1b0] sm:$0xff]  ;;  %v64_v46 = vld [vmem:[%s1145_s2 + $0xc0] sm:$0xff] }
   0xb   :  { %720 = vmatpush3.bf16.msra.mxu1 %v719_v25  ;;  %v95_v42 = vld [vmem:[%s1145_s2 + $0x1b8] sm:$0xff]  ;;  %v78_v44 = vld [vmem:[%s1145_s2 + $0x130] sm:$0xff]  ;;  %v65_v47 = vld [vmem:[%s1145_s2 + $0xc8] sm:$0xff]  ;;  %v695_v48 = vpack.c.bf16 %v47_v40, %v46_v37 }
   0xc   :  { %722 = vmatprep.subr.bf16.mxu1 %v721_v34  ;;  %v725_v43 = vpack.c.bf16 %v95_v42, %v94_v41  ;;  %v79_v45 = vld [vmem:[%s1145_s2 + $0x138] sm:$0xff]  ;;  %v96_v49 = vld [vmem:[%s1145_s2 + $0x1c0] sm:$0xff]  ;;  %v97_v50 = vld [vmem:[%s1145_s2 + $0x1c8] sm:$0xff]  ;;  %v697_v52 = vpack.c.bf16 %v65_v47, %v64_v46 }
   0xd   :  { %692 = vmatpush3.bf16.msra.mxu0 %v691_v33  ;;  %v727_v51 = vpack.c.bf16 %v79_v45, %v78_v44  ;;  %v48_v53 = vld [vmem:[%s1145_s2 + $0x40] sm:$0xff]  ;;  %v49_v54 = vld [vmem:[%s1145_s2 + $0x48] sm:$0xff]  ;;  %v729_v56 = vpack.c.bf16 %v97_v50, %v96_v49  ;;  %v66_v58 = vld [vmem:[%s1145_s2 + $0xd0] sm:$0xff] }
   0xe   :  { %694 = vmatprep.subr.bf16.mxu0 %v693_v39  ;;  %v80_v55 = vld [vmem:[%s1145_s2 + $0x140] sm:$0xff]  ;;  %v81_v57 = vld [vmem:[%s1145_s2 + $0x148] sm:$0xff]  ;;  %v67_v59 = vld [vmem:[%s1145_s2 + $0xd8] sm:$0xff]  ;;  %v699_v62 = vpack.c.bf16 %v49_v54, %v48_v53 }
   0xf   :  { %724 = vmatpush3.bf16.msra.mxu1 %v723_v38  ;;  %v98_v60 = vld [vmem:[%s1145_s2 + $0x1d0] sm:$0xff]  ;;  %v99_v61 = vld [vmem:[%s1145_s2 + $0x1d8] sm:$0xff]  ;;  %v731_v63 = vpack.c.bf16 %v81_v57, %v80_v55  ;;  %v701_v0 = vpack.c.bf16 %v67_v59, %v66_v58  ;;  %v68_v6 = vld [vmem:[%s1145_s2 + $0xe0] sm:$0xff] }
  0x10   :  { %726 = vmatprep.subr.bf16.mxu1 %v725_v43  ;;  %v50_v1 = vld [vmem:[%s1145_s2 + $0x50] sm:$0xff]  ;;  %v51_v2 = vld [vmem:[%s1145_s2 + $0x58] sm:$0xff]  ;;  %v733_v4 = vpack.c.bf16 %v99_v61, %v98_v60  ;;  %v69_v7 = vld [vmem:[%s1145_s2 + $0xe8] sm:$0xff] }
  0x11   :  { %696 = vmatpush3.bf16.msra.mxu0 %v695_v48  ;;  %v82_v3 = vld [vmem:[%s1145_s2 + $0x150] sm:$0xff]  ;;  %v83_v5 = vld [vmem:[%s1145_s2 + $0x158] sm:$0xff]  ;;  %v100_v8 = vld [vmem:[%s1145_s2 + $0x1e0] sm:$0xff]  ;;  %v703_v10 = vpack.c.bf16 %v51_v2, %v50_v1  ;;  %v705_v14 = vpack.c.bf16 %v69_v7, %v68_v6 }
  0x12   :  { %698 = vmatprep.subr.bf16.mxu0 %v697_v52  ;;  %v101_v9 = vld [vmem:[%s1145_s2 + $0x1e8] sm:$0xff]  ;;  %v52_v11 = vld [vmem:[%s1145_s2 + $0x60] sm:$0xff]  ;;  %v735_v13 = vpack.c.bf16 %v83_v5, %v82_v3  ;;  %v70_v19 = vld [vmem:[%s1145_s2 + $0xf0] sm:$0xff] }
  0x13   :  { %728 = vmatpush3.bf16.msra.mxu1 %v727_v51  ;;  %v21_v12 = vld [vmem:[%s1146_s0 + $0x8] sm:$0xff]  ;;  %v84_v16 = vld [vmem:[%s1145_s2 + $0x160] sm:$0xff]  ;;  %v737_v18 = vpack.c.bf16 %v101_v9, %v100_v8  ;;  %v71_v20 = vld [vmem:[%s1145_s2 + $0xf8] sm:$0xff] }
  0x14   :  { %730 = vmatprep.subr.bf16.mxu1 %v729_v56  ;;  %v53_v15 = vld [vmem:[%s1145_s2 + $0x68] sm:$0xff]  ;;  %206 = vmatprep.mubr.f32.mxu0 %v21_v12  ;;  %v23_v21 = vld [vmem:[%s1146_s0 + $0x18] sm:$0xff]  ;;  %v102_v22 = vld [vmem:[%s1145_s2 + $0x1f0] sm:$0xff]  ;;  %v709_v26 = vpack.c.bf16 %v71_v20, %v70_v19 }
  0x15   :  { %700 = vmatpush3.bf16.msra.mxu0 %v699_v62  ;;  %v85_v17 = vld [vmem:[%s1145_s2 + $0x168] sm:$0xff]  ;;  %v103_v23 = vld [vmem:[%s1145_s2 + $0x1f8] sm:$0xff]  ;;  %291 = vmatprep.mubr.f32.mxu1 %v23_v21  ;;  %v707_v24 = vpack.c.bf16 %v53_v15, %v52_v11  ;;  %v54_v27 = vld [vmem:[%s1145_s2 + $0x70] sm:$0xff] }
  0x16   :  { %702 = vmatprep.subr.bf16.mxu0 %v701_v0  ;;  %v739_v25 = vpack.c.bf16 %v85_v17, %v84_v16  ;;  %v55_v28 = vld [vmem:[%s1145_s2 + $0x78] sm:$0xff]  ;;  %v86_v29 = vld [vmem:[%s1145_s2 + $0x170] sm:$0xff]  ;;  %v741_v30 = vpack.c.bf16 %v103_v23, %v102_v22  ;;  %v104_v32 = vld [vmem:[%s1145_s2 + $0x200] sm:$0xff] }
  0x17   :  { %732 = vmatpush3.bf16.msra.mxu1 %v731_v63  ;;  %v87_v31 = vld [vmem:[%s1145_s2 + $0x178] sm:$0xff]  ;;  %v105_v33 = vld [vmem:[%s1145_s2 + $0x208] sm:$0xff]  ;;  %v116_v34 = vld [vmem:[%s1147_s3] sm:$0xff]  ;;  %v711_v36 = vpack.c.bf16 %v55_v28, %v54_v27 }
  0x18   :  { %734 = vmatprep.subr.bf16.mxu1 %v733_v4  ;;  %v117_v35 = vld [vmem:[%s1147_s3 + $0x8] sm:$0xff]  ;;  %v743_v37 = vpack.c.bf16 %v87_v31, %v86_v29  ;;  %v745_v38 = vpack.c.bf16 %v105_v33, %v104_v32  ;;  %v106_v40 = vld [vmem:[%s1145_s2 + $0x210] sm:$0xff]  ;;  %v107_v41 = vld [vmem:[%s1145_s2 + $0x218] sm:$0xff] }
  0x19   :  { %704 = vmatpush3.bf16.msra.mxu0 %v703_v10  ;;  %v761_v39 = vpack.c.bf16 %v117_v35, %v116_v34  ;;  %v20_v42 = vld [vmem:[%s1146_s0] sm:$0xff]  ;;  %v118_v43 = vld [vmem:[%s1147_s3 + $0x10] sm:$0xff]  ;;  %v119_v44 = vld [vmem:[%s1147_s3 + $0x18] sm:$0xff]  ;;  %v749_v47 = vpack.c.bf16 %v107_v41, %v106_v40 }
  0x1a   :  { %706 = vmatprep.subr.bf16.mxu0 %v705_v14  ;;  %v22_v45 = vld [vmem:[%s1146_s0 + $0x10] sm:$0xff]  ;;  %v28_v48 = vld [vmem:[%s1146_s0 + $0x40] sm:$0xff]  ;;  %v765_v49 = vpack.c.bf16 %v119_v44, %v118_v43  ;;  %v109_v51 = vld [vmem:[%s1145_s2 + $0x228] sm:$0xff] }
  0x1b   :  { %736 = vmatpush3.bf16.msra.mxu1 %v735_v13  ;;  %v26_v46 = vld [vmem:[%s1146_s0 + $0x30] sm:$0xff]  ;;  %v108_v50 = vld [vmem:[%s1145_s2 + $0x220] sm:$0xff]  ;;  %v25_v52 = vld [vmem:[%s1146_s0 + $0x28] sm:$0xff] }
  0x1c   :  { %738 = vmatprep.subr.bf16.mxu1 %v737_v18  ;;  %v120_v53 = vld [vmem:[%s1147_s3 + $0x20] sm:$0xff]  ;;  %v121_v54 = vld [vmem:[%s1147_s3 + $0x28] sm:$0xff]  ;;  %v27_v55 = vld [vmem:[%s1146_s0 + $0x38] sm:$0xff]  ;;  %v753_v57 = vpack.c.bf16 %v109_v51, %v108_v50 }
  0x1d   :  { %708 = vmatpush3.bf16.msra.mxu0 %v707_v24  ;;  %v31_v56 = vld [vmem:[%s1146_s0 + $0x58] sm:$0xff]  ;;  %v33_v58 = vld [vmem:[%s1146_s0 + $0x68] sm:$0xff]  ;;  %v769_v59 = vpack.c.bf16 %v121_v54, %v120_v53  ;;  %v110_v60 = vld [vmem:[%s1145_s2 + $0x230] sm:$0xff] }
  0x1e   :  { %710 = vmatprep.subr.bf16.mxu0 %v709_v26  ;;  %v111_v61 = vld [vmem:[%s1145_s2 + $0x238] sm:$0xff]  ;;  %v30_v62 = vld [vmem:[%s1146_s0 + $0x50] sm:$0xff]  ;;  %v32_v1 = vld [vmem:[%s1146_s0 + $0x60] sm:$0xff] }
  0x1f   :  { %740 = vmatpush3.bf16.msra.mxu1 %v739_v25  ;;  %v122_v63 = vld [vmem:[%s1147_s3 + $0x30] sm:$0xff]  ;;  %v123_v0 = vld [vmem:[%s1147_s3 + $0x38] sm:$0xff]  ;;  %v36_v2 = vld [vmem:[%s1146_s0 + $0x80] sm:$0xff]  ;;  %v757_v3 = vpack.c.bf16 %v111_v61, %v110_v60 }
  0x20   :  { %742 = vmatprep.subr.bf16.mxu1 %v741_v30  ;;  %v38_v4 = vld [vmem:[%s1146_s0 + $0x90] sm:$0xff]  ;;  %v773_v5 = vpack.c.bf16 %v123_v0, %v122_v63  ;;  %v35_v6 = vld [vmem:[%s1146_s0 + $0x78] sm:$0xff]  ;;  %v37_v7 = vld [vmem:[%s1146_s0 + $0x88] sm:$0xff] }
  0x21   :  { %712 = vmatpush3.bf16.msra.mxu0 %v711_v36  ;;  %v24_v8 = vld [vmem:[%s1146_s0 + $0x20] sm:$0xff]  ;;  %v29_v10 = vld [vmem:[%s1146_s0 + $0x48] sm:$0xff]  ;;  %v34_v12 = vld [vmem:[%s1146_s0 + $0x70] sm:$0xff] }
  0x22   :  { %746 = vmatprep.subr.bf16.mxu0 %v745_v38  ;;  %v112_v9 = vld [vmem:[%s1148_s1] sm:$0xff]  ;;  %v113_v11 = vld [vmem:[%s1148_s1 + $0x8] sm:$0xff]  ;;  %v114_v13 = vld [vmem:[%s1148_s1 + $0x10] sm:$0xff] }
  0x23   :  { %744 = vmatpush3.bf16.msra.mxu1 %v743_v37  ;;  %v39_v14 = vld [vmem:[%s1146_s0 + $0x98] sm:$0xff]  ;;  %v515_v17 = vld [vmem:[%s1149_s4] ss:$0 sm:$0xff] }
  0x24   :  { %762 = vmatprep.subr.bf16.mxu1 %v761_v39  ;;  %207 = vmatmul.mubr.f32.vlgmr.msra.gmra.mrb[0].mxu0 %v20_v42  ;;  %v115_v15 = vld [vmem:[%s1148_s1 + $0x18] sm:$0xff] }
  0x25   :  { %748 = vmatpush3.bf16.msra.mxu0 %v745_v38  ;;  %211 = vmatprep.mubr.f32.mxu0 %v26_v46 }
  0x26   :  { %292 = vmatmul.mubr.f32.vlgmr.msra.gmra.mrb[0].mxu1 %v22_v45  ;;  %750 = vmatprep.subr.bf16.mxu0 %v749_v47 }
  0x27   :  { %764 = vmatpush3.bf16.msra.mxu1 %v761_v39  ;;  %296 = vmatprep.mubr.f32.mxu1 %v28_v48 }
  0x28   :  { %212 = vmatmul.mubr.f32.gmra.mrb[2].mxu0 %v25_v52  ;;  %766 = vmatprep.subr.bf16.mxu1 %v765_v49 }
  0x29   :  { %752 = vmatpush3.bf16.msra.mxu0 %v749_v47  ;;  %216 = vmatprep.mubr.f32.mxu0 %v31_v56  ;;  %v520_v47 = vld [vmem:[%s1149_s4 + $0x1] ss:$0 sm:$0xff] }
  0x2a   :  { %297 = vmatmul.mubr.f32.gmra.mrb[2].mxu1 %v27_v55  ;;  %754 = vmatprep.subr.bf16.mxu0 %v753_v57 }
  0x2b   :  { %768 = vmatpush3.bf16.msra.mxu1 %v765_v49  ;;  %301 = vmatprep.mubr.f32.mxu1 %v33_v58 }
  0x2c   :  { %217 = vmatmul.mubr.f32.gmra.mrb[4].mxu0 %v30_v62  ;;  %770 = vmatprep.subr.bf16.mxu1 %v769_v59 }
  0x2d   :  { %756 = vmatpush3.bf16.msra.mxu0 %v753_v57  ;;  %221 = vmatprep.mubr.f32.mxu0 %v36_v2 }
  0x2e   :  { %302 = vmatmul.mubr.f32.gmra.mrb[4].mxu1 %v32_v1  ;;  %758 = vmatprep.subr.bf16.mxu0 %v757_v3 }
  0x2f   :  { %772 = vmatpush3.bf16.msra.mxu1 %v769_v59  ;;  %306 = vmatprep.mubr.f32.mxu1 %v38_v4 }
  0x30   :  { %222 = vmatmul.mubr.f32.gmra.mrb[6].mxu0 %v35_v6  ;;  %774 = vmatprep.subr.bf16.mxu1 %v773_v5 }
  0x31   :  { %760 = vmatpush3.bf16.msra.mxu0 %v757_v3  ;;  %653 = vmatprep.mubr.msk.f32.mxu0 %vm129_vm0, %v24_v8 }
  0x32   :  { %307 = vmatmul.mubr.f32.gmra.mrb[6].mxu1 %v37_v7 }
  0x33   :  { %776 = vmatpush3.bf16.msra.mxu1 %v773_v5  ;;  %675 = vmatprep.mubr.msk.f32.mxu1 %vm129_vm0, %v112_v9 }
  0x34   :  { %654 = vmatmul.mubr.msk.f32.vlgmr.msra.gmra.mrb[8].mxu0 %vm129_vm0, %v29_v10 }
  0x35   :  { %656 = vmatprep.mubr.msk.f32.mxu0 %vm129_vm0, %v34_v12 }
  0x36   :  { %676 = vmatmul.mubr.msk.f32.vlgmr.msra.gmra.mrb[8].mxu1 %vm129_vm0, %v113_v11 }
  0x37   :  { %678 = vmatprep.mubr.msk.f32.mxu1 %vm129_vm0, %v114_v13 }
  0x38   :  { %657 = vmatmul.mubr.msk.f32.gmra.mrb[10].mxu0 %vm129_vm0, %v39_v14 }
  0x3a   :  { %679 = vmatmul.mubr.msk.f32.gmra.mrb[10].mxu1 %vm129_vm0, %v115_v15 }
  0xf7   :  { %v557_v16 = vpop.f32.mrb[0].mxu0 }
  0xf8   :  { %v558_v18 = vpop.f32.mrb[1].mxu0 }
  0xf9   :  { %v601_v19 = vpop.f32.mrb[0].mxu1  ;;  %v559_v20 = vadd.f32 %v558_v18, %v557_v16 }
  0xfa   :  { %v602_v21 = vpop.f32.mrb[1].mxu1 }
  0xfb   :  { %v603_v22 = vadd.f32 %v602_v21, %v601_v19  ;;  %v209_v23 = vadd.f32 %v559_v20, %v515_v17  ;;  %v560_v24 = vpop.f32.mrb[2].mxu0 }
  0xfc   :  { %v561_v25 = vpop.f32.mrb[3].mxu0 }
  0xfd   :  { %v604_v26 = vpop.f32.mrb[2].mxu1  ;;  %v562_v27 = vadd.f32 %v561_v25, %v560_v24  ;;  %v294_v29 = vadd.f32 %v603_v22, %v209_v23 }
  0xfe   :  { %v605_v28 = vpop.f32.mrb[3].mxu1 }
  0xff   :  { %v606_v30 = vadd.f32 %v605_v28, %v604_v26  ;;  %v214_v31 = vadd.f32 %v562_v27, %v515_v17  ;;  %v563_v32 = vpop.f32.mrb[4].mxu0 }
 0x100   :  { %v564_v33 = vpop.f32.mrb[5].mxu0 }
 0x101   :  { %v607_v34 = vpop.f32.mrb[4].mxu1  ;;  %v565_v35 = vadd.f32 %v564_v33, %v563_v32  ;;  %v299_v37 = vadd.f32 %v606_v30, %v214_v31 }
 0x102   :  { %v608_v36 = vpop.f32.mrb[5].mxu1 }
 0x103   :  { %v609_v38 = vadd.f32 %v608_v36, %v607_v34  ;;  %v219_v39 = vadd.f32 %v565_v35, %v515_v17  ;;  %v566_v40 = vpop.f32.mrb[6].mxu0 }
 0x104   :  { %v567_v41 = vpop.f32.mrb[7].mxu0 }
 0x105   :  { %v610_v42 = vpop.f32.mrb[6].mxu1  ;;  %v568_v43 = vadd.f32 %v567_v41, %v566_v40  ;;  %v304_v45 = vadd.f32 %v609_v38, %v219_v39 }
 0x106   :  { %v611_v44 = vpop.f32.mrb[7].mxu1 }
 0x107   :  { %v612_v46 = vadd.f32 %v611_v44, %v610_v42  ;;  %v224_v48 = vadd.f32 %v568_v43, %v515_v17  ;;  %v655_v49 = vpop.f32.mrb[8].mxu0 }
 0x108   :  { %v384_v50 = vadd.f32 %v655_v49, %v299_v37  ;;  %v378_v51 = vpop.f32.mrb[9].mxu0 }
 0x109   :  { %v677_v52 = vpop.f32.mrb[8].mxu1  ;;  %v379_v53 = vadd.f32 %v378_v51, %v294_v29  ;;  %v309_v56 = vadd.f32 %v612_v46, %v224_v48 }
 0x10a   :  { %v490_v54 = vadd.f32 %v677_v52, %v520_v47  ;;  %v484_v55 = vpop.f32.mrb[9].mxu1  ;;  %v398_v57 = vmax.f32 %v384_v50, 0.0 }
 0x10b   :  { %v485_v58 = vadd.f32 %v520_v47, %v484_v55  ;;  %v397_v59 = vmax.f32 %v379_v53, 0.0  ;;  %v658_v60 = vpop.f32.mrb[10].mxu0 }
 0x10c   :  { %v504_v61 = vadd.f32 %v490_v54, %v398_v57  ;;  %v394_v62 = vadd.f32 %v658_v60, %v309_v56  ;;  %v388_v63 = vpop.f32.mrb[11].mxu0 }
 0x10d   :  { %v680_v0 = vpop.f32.mrb[10].mxu1  ;;  %v503_v1 = vadd.f32 %v485_v58, %v397_v59  ;;  %v389_v2 = vadd.f32 %v388_v63, %v304_v45 }
 0x10e   :  { %v500_v3 = vadd.f32 %v680_v0, %v520_v47  ;;  %v494_v4 = vpop.f32.mrb[11].mxu1  ;;  %508 = vst [vmem:[%s1150_s5 + $0x8] sm:$0xff] %v504_v61  ;;  %v400_v5 = vmax.f32 %v394_v62, 0.0 }
 0x10f   :  { %v495_v6 = vadd.f32 %v520_v47, %v494_v4  ;;  %507 = vst [vmem:[%s1150_s5] sm:$0xff] %v503_v1  ;;  %v399_v7 = vmax.f32 %v389_v2, 0.0 }
 0x110   :  { %v506_v8 = vadd.f32 %v500_v3, %v400_v5 }
 0x111   :  { %v505_v9 = vadd.f32 %v495_v6, %v399_v7 }
 0x112   :  { %510 = vst [vmem:[%s1150_s5 + $0x18] sm:$0xff] %v506_v8 }
 0x113   :  { %509 = vst [vmem:[%s1150_s5 + $0x10] sm:$0xff] %v505_v9 }

</bundles_post_ra>
